<compile_context>
chip_gen: v7x
topology: tpu7x:2x2x1
jax: 0.10.0
libtpu: 0.0.40
codegen_flags: <defaults>
</compile_context>

<pallas_src>
import functools

import jax
import jax.numpy as jnp
from jax.experimental import pallas as pl
from jax.experimental.pallas import tpu as pltpu

_LANE = 128
_SUBLANE = 8


def _round_up(x, m):
    return ((x + m - 1) // m) * m


# --------------------------------------------------------------------------- capability probes
def _copy_probe_kernel(x_ref, o_ref):
    o_ref[...] = x_ref[...]


def _reshape_probe_kernel(x_ref, o_ref):
    o_ref[...] = x_ref[...].reshape(o_ref.shape)


@functools.lru_cache(maxsize=None)
def _single_buffer_supported():
    """pipeline_mode=pl.Buffered(1) on constant-index blocks (halves weight VMEM)."""
    try:
        x = jnp.ones((_SUBLANE, _LANE), jnp.float32)
        out = pl.pallas_call(
            _copy_probe_kernel,
            grid=(1,),
            in_specs=[pl.BlockSpec((_SUBLANE, _LANE), lambda i: (0, 0),
                                   pipeline_mode=pl.Buffered(1))],
            out_specs=pl.BlockSpec((_SUBLANE, _LANE), lambda i: (0, 0)),
            out_shape=jax.ShapeDtypeStruct((_SUBLANE, _LANE), jnp.float32),
        )(x)
        out = jax.block_until_ready(out)
        return bool(jnp.all(out == 1.0))
    except Exception:
        return False


@functools.lru_cache(maxsize=None)
def _flat_out_supported(rows, d):
    """In-kernel (rows, d) -> (rows*d/128, 128) repack for lane-dense stores."""
    try:
        x = jnp.arange(rows * d, dtype=jnp.float32).reshape(rows, d)
        out = pl.pallas_call(
            _reshape_probe_kernel,
            out_shape=jax.ShapeDtypeStruct((rows * d // _LANE, _LANE), jnp.float32),
        )(x)
        out = jax.block_until_ready(out)
        return bool(jnp.array_equal(out.reshape(rows, d), x))
    except Exception:
        return False


@functools.lru_cache(maxsize=None)
def _vmem_capacity_bytes():
    try:
        cap = int(getattr(pltpu.get_tpu_info(), "vmem_capacity_bytes", 0))
        if cap > 0:
            return cap
    except Exception:
        pass
    return 64 * 1024 * 1024  # conservative default (v7x per-TensorCore VMEM)


# --------------------------------------------------------------------------- parameter prep (hoisted)
def prepare_swiglu_params(w1, b1, w3, b3, w2, b2, *, compute_dtype=jnp.bfloat16):
    """Pack / lane-pad / cast the SwiGLU weights ONCE, outside the per-call path.

    w1, w3: (D, H); w2: (H, D); biases (H,), (H,), (D,) or all None.
    w1/w3 are packed column-wise into one (D, 2*H_pad) matrix so both input
    projections are a single MXU matmul; each half is padded to a 128-lane
    boundary so the in-kernel u/v split is a free, lane-aligned static slice.
    """
    has_bias = b1 is not None
    assert all((b is None) == (not has_bias) for b in (b1, b3, b2)), (
        "bias must be present for all three projections or for none")
    D, H = w1.shape
    assert w3.shape == (D, H) and w2.shape == (H, D)
    H_pad = _round_up(H, _LANE)

    w13 = jnp.zeros((D, 2 * H_pad), compute_dtype)
    w13 = w13.at[:, :H].set(w1.astype(compute_dtype))
    w13 = w13.at[:, H_pad:H_pad + H].set(w3.astype(compute_dtype))
    w2p = jnp.zeros((H_pad, D), compute_dtype).at[:H, :].set(w2.astype(compute_dtype))

    params = dict(w13=w13, w2=w2p, b13=None, b2=None,
                  dim=D, hidden=H, h_pad=H_pad, has_bias=has_bias)
    if has_bias:
        b13 = jnp.zeros((1, 2 * H_pad), jnp.float32)
        b13 = b13.at[0, :H].set(b1.astype(jnp.float32))
        b13 = b13.at[0, H_pad:H_pad + H].set(b3.astype(jnp.float32))
        params["b13"] = b13
        params["b2"] = b2.astype(jnp.float32).reshape(1, D)
    return params


# --------------------------------------------------------------------------- kernel
def _swiglu_mlp_kernel(*refs, h_pad, use_sq_relu, has_bias):
    """Fused SwiGLU MLP tile: y = (act(x@w1 + b1) * (x@w3 + b3)) @ w2 + b2.

    w1|w3 arrive packed (and 128-lane padded) as w13.  MXU operands use the
    weights' dtype (bf16 by default; x is cast in-kernel); accumulation, bias
    adds and all elementwise math stay f32.
    """
    if has_bias:
        x_ref, w13_ref, b13_ref, w2_ref, b2_ref, o_ref = refs
    else:
        x_ref, w13_ref, w2_ref, o_ref = refs
        b13_ref = b2_ref = None

    x = x_ref[...].astype(w13_ref.dtype)                  # in-kernel cast (VPU, hidden under MXU)
    y = jnp.dot(x, w13_ref[...], preferred_element_type=jnp.float32)  # (tn, 2*h_pad) f32
    if b13_ref is not None:
        y = y + b13_ref[...]

    u = y[:, :h_pad]          # w1(x) -> activation input (lane-aligned view)
    v = y[:, h_pad:]          # w3(x) -> linear gate path  (lane-aligned view)
    if use_sq_relu:
        act = jnp.square(jnp.maximum(u, 0.0))
    else:
        # SiLU: exp and the approx reciprocal both go to the EUP slot.
        act = u * pl.reciprocal(1.0 + jnp.exp(-u), approx=True)
    h = act * v                                                       # (tn, h_pad) f32

    out = jnp.dot(h.astype(w2_ref.dtype), w2_ref[...],
                  preferred_element_type=jnp.float32)                 # (tn, D) f32
    if b2_ref is not None:
        out = out + b2_ref[...]
    # o_ref is either (tn, D) or a lane-dense (tn*D/128, 128) slab.
    o_ref[...] = out.astype(o_ref.dtype).reshape(o_ref.shape)


# --------------------------------------------------------------------------- tiling
def _choose_row_tile(N, D, h_pad, in_itemsize, out_itemsize, weight_bytes,
                     single_buffer_weights):
    """Largest row tile fitting a per-generation VMEM byte budget."""
    vmem_cap = _vmem_capacity_bytes()
    resident = weight_bytes * (1 if single_buffer_weights else 2)
    budget = int(0.8 * vmem_cap) - resident - (2 << 20)   # headroom for compiler scratch
    per_row = (2 * in_itemsize * D          # x tile (double buffered)
               + 2 * out_itemsize * D       # out tile (double buffered)
               + 4 * (2 * h_pad)            # f32 packed projection
               + 4 * (2 * h_pad)            # f32 activation / gate temporaries
               + 4 * D)                     # f32 result before the store
    tn = _SUBLANE
    for cand in (2048, 1024, 512, 256, 128, 64, 32, 16, 8):
        if cand * per_row <= budget:
            tn = cand
            break
    if N >= 512:
        # >=2 row tiles so both v7x TensorCores get work ("parallel" grid axis).
        tn = min(tn, _round_up(pl.cdiv(N, 2), _SUBLANE))
    if tn >= N:
        return N, 1
    tn = max(_SUBLANE, (tn // _SUBLANE) * _SUBLANE)
    return tn, pl.cdiv(N, tn)


# --------------------------------------------------------------------------- wrapper
def swiglu_mlp(x, params, *, use_sq_relu=False):
    """Fused SwiGLU MLP forward.  `params` comes from prepare_swiglu_params.

    Dropout p = 0.0 -> identity.
    # TODO(synk): non-zero dropout would need pltpu.prng_seed/prng_random_bits masking.
    """
    D, H_pad, has_bias = params["dim"], params["h_pad"], params["has_bias"]
    w13, w2p, b13, b2 = params["w13"], params["w2"], params["b13"], params["b2"]

    orig_shape = x.shape
    assert orig_shape[-1] == D
    x2 = x.reshape(-1, D)                    # no cast / no pad here (done in-kernel)
    N = x2.shape[0]
    out_dtype = x.dtype

    weight_bytes = (w13.size * w13.dtype.itemsize + w2p.size * w2p.dtype.itemsize)
    if has_bias:
        weight_bytes += b13.size * b13.dtype.itemsize + b2.size * b2.dtype.itemsize

    single_buf = _single_buffer_supported()
    tn, grid_n = _choose_row_tile(N, D, H_pad, x2.dtype.itemsize,
                                  jnp.dtype(out_dtype).itemsize,
                                  weight_bytes, single_buf)
    # TODO(synk): stream (D,2H)/(H,D) weight tiles (column/K-tiled grid with an
    # f32 VMEM accumulator) once the packed weights no longer fit this budget.

    # Lane-dense output slab for D < 128 (unmasked stores); probe-gated.
    flat_out = (D % _LANE != 0 and _LANE % D == 0
                and (N * D) % _LANE == 0 and (tn * D) % _LANE == 0
                and (grid_n == 1 or (N % tn == 0 and (tn * D // _LANE) % _SUBLANE == 0))
                and _flat_out_supported(tn, D))

    def const_spec(shape):
        if single_buf:
            return pl.BlockSpec(shape, lambda i: (0, 0), pipeline_mode=pl.Buffered(1))
        return pl.BlockSpec(shape, lambda i: (0, 0))

    in_specs = [pl.BlockSpec((tn, D), lambda i: (i, 0)),
                const_spec((D, 2 * H_pad))]
    args = [x2, w13]
    if has_bias:
        in_specs.append(const_spec((1, 2 * H_pad)))
        args.append(b13)
    in_specs.append(const_spec((H_pad, D)))
    args.append(w2p)
    if has_bias:
        in_specs.append(const_spec((1, D)))
        args.append(b2)

    if flat_out:
        out_specs = pl.BlockSpec((tn * D // _LANE, _LANE), lambda i: (i, 0))
        out_shape = jax.ShapeDtypeStruct((N * D // _LANE, _LANE), out_dtype)
    else:
        out_specs = pl.BlockSpec((tn, D), lambda i: (i, 0))
        out_shape = jax.ShapeDtypeStruct((N, D), out_dtype)

    # Explicit VMEM limit (v5e's default scoped limit is only 16 MiB).
    needed = (weight_bytes * (1 if single_buf else 2)
              + tn * (2 * x2.dtype.itemsize * D
                      + 2 * jnp.dtype(out_dtype).itemsize * D
                      + 4 * (4 * H_pad + D)))
    vmem_limit = int(min(0.9 * _vmem_capacity_bytes(), max(2 * needed, 32 << 20)))

    out = pl.pallas_call(
        functools.partial(_swiglu_mlp_kernel, h_pad=H_pad,
                          use_sq_relu=use_sq_relu, has_bias=has_bias),
        grid=(grid_n,),
        in_specs=in_specs,
        out_specs=out_specs,
        out_shape=out_shape,
        compiler_params=pltpu.CompilerParams(
            dimension_semantics=("parallel",),        # row tiles across TCs (v7x)
            vmem_limit_bytes=vmem_limit),
    )(*args)

    return out.reshape(orig_shape)


# --------------------------------------------------------------------------- pure-f32 reference
def mlp_reference(x, w1, b1, w3, b3, w2, b2, *, use_sq_relu=False):
    """Pure f32 reference (matches the PyTorch module's numerics; dropout p=0)."""
    y1 = x @ w1
    y3 = x @ w3
    if b1 is not None:
        y1 = y1 + b1
        y3 = y3 + b3
    act = jnp.square(jnp.maximum(y1, 0.0)) if use_sq_relu else y1 * jax.nn.sigmoid(y1)
    out = (act * y3) @ w2
    if b2 is not None:
        out = out + b2
    return out


# --------------------------------------------------------------------------- main
if __name__ == "__main__":
    # config: d_model=32, mlp_scale=2.0 -> h_dim=64, bias=True, dropout=0.0,
    # use_sq_relu=False.  Input: (batch=2, seq=8, d_model=32).
    D, H = 32, 64
    B, T = 2, 8

    key = jax.random.PRNGKey(0)
    k_x, k_w1, k_w3, k_w2, k_b1, k_b3, k_b2 = jax.random.split(key, 7)
    x = jax.random.normal(k_x, (B, T, D), jnp.float32)
    w1 = jax.random.normal(k_w1, (D, H), jnp.float32) * D ** -0.5
    w3 = jax.random.normal(k_w3, (D, H), jnp.float32) * D ** -0.5
    w2 = jax.random.normal(k_w2, (H, D), jnp.float32) * H ** -0.5
    b1 = jax.random.normal(k_b1, (H,), jnp.float32) * 0.01
    b3 = jax.random.normal(k_b3, (H,), jnp.float32) * 0.01
    b2 = jax.random.normal(k_b2, (D,), jnp.float32) * 0.01

    # f32 ground truth (full-precision matmuls) -- not a bf16-matched reference.
    with jax.default_matmul_precision("float32"):
        ref = jax.block_until_ready(
            mlp_reference(x, w1, b1, w3, b3, w2, b2, use_sq_relu=False))
        ref_sq = jax.block_until_ready(
            mlp_reference(x, w1, b1, w3, b3, w2, b2, use_sq_relu=True))

    # Production path: bf16 MXU feed, f32 accumulation.
    params_bf16 = prepare_swiglu_params(w1, b1, w3, b3, w2, b2,
                                        compute_dtype=jnp.bfloat16)
    out = jax.block_until_ready(swiglu_mlp(x, params_bf16, use_sq_relu=False))
    assert out.shape == (B, T, D) and out.dtype == x.dtype
    err = float(jnp.max(jnp.abs(out - ref)))
    assert jnp.allclose(out, ref, atol=5e-2, rtol=5e-2), f"bf16 path max abs err {err}"

    # f32-MXU validation path (same kernel, float32 weight feed).
    params_f32 = prepare_swiglu_params(w1, b1, w3, b3, w2, b2,
                                       compute_dtype=jnp.float32)
    out_f32 = jax.block_until_ready(swiglu_mlp(x, params_f32, use_sq_relu=False))
    err32 = float(jnp.max(jnp.abs(out_f32 - ref)))
    assert jnp.allclose(out_f32, ref, atol=5e-2, rtol=5e-2), f"f32 path max abs err {err32}"

    # Squared-ReLU variant of the activation.
    out_sq = jax.block_until_ready(swiglu_mlp(x, params_bf16, use_sq_relu=True))
    err_sq = float(jnp.max(jnp.abs(out_sq - ref_sq)))
    assert jnp.allclose(out_sq, ref_sq, atol=1e-1, rtol=1e-1), \
        f"sq_relu path max abs err {err_sq}"

    print("KERNEL_OK")
</pallas_src>

<mosaic_0001>
module attributes {stable_mosaic.version = 11 : i64} {
  func.func @_copy_probe_kernel(%arg0: i32, %arg1: memref<8x128xf32, #tpu.memory_space<vmem>>, %arg2: memref<8x128xf32, #tpu.memory_space<vmem>>) attributes {dimension_semantics = [#tpu.dimension_semantics<arbitrary>], iteration_bounds = array<i64: 1>, scalar_prefetch = 0 : i64, scratch_operands = 0 : i64, tpu.core_type = #tpu.core_type<tc>, window_params = [{pipeline_mode = #tpu.pipeline_mode<synchronous>, transform_indices = @transform_0, window_bounds = array<i64: 8, 128>}, {pipeline_mode = #tpu.pipeline_mode<synchronous>, transform_indices = @transform_1, window_bounds = array<i64: 8, 128>}]} {
    %c0 = arith.constant 0 : index
    %c0_0 = arith.constant 0 : index
    %0 = vector.load %arg1[%c0, %c0_0] : memref<8x128xf32, #tpu.memory_space<vmem>>, vector<8x128xf32>
    %c0_1 = arith.constant 0 : index
    %c0_2 = arith.constant 0 : index
    %1 = vector.load %arg2[%c0_1, %c0_2] : memref<8x128xf32, #tpu.memory_space<vmem>>, vector<8x128xf32>
    tpu.vector_store %arg2[%c0_1, %c0_2], %0 {strides = array<i32>} : memref<8x128xf32, #tpu.memory_space<vmem>>, vector<8x128xf32>,
    return
  }
  func.func @transform_0(%arg0: i32) -> (i32, i32) {
    %c0_i32 = arith.constant 0 : i32
    %c0_i32_0 = arith.constant 0 : i32
    %c0_i32_1 = arith.constant 0 : i32
    return %c0_i32, %c0_i32_0 : i32, i32
  }
  func.func @transform_1(%arg0: i32) -> (i32, i32) {
    %c0_i32 = arith.constant 0 : i32
    %c0_i32_0 = arith.constant 0 : i32
    %c0_i32_1 = arith.constant 0 : i32
    return %c0_i32, %c0_i32_0 : i32, i32
  }
}

module attributes {stable_mosaic.version = 11 : i64} {
  func.func @_reshape_probe_kernel(%arg0: memref<16x32xf32, #tpu.memory_space<vmem>>, %arg1: memref<4x128xf32, #tpu.memory_space<vmem>>) attributes {dimension_semantics = [], scalar_prefetch = 0 : i64, scratch_operands = 0 : i64, tpu.core_type = #tpu.core_type<tc>} {
    %c0 = arith.constant 0 : index
    %c0_0 = arith.constant 0 : index
    %0 = vector.load %arg0[%c0, %c0_0] : memref<16x32xf32, #tpu.memory_space<vmem>>, vector<16x32xf32>
    %1 = vector.shape_cast %0 : vector<16x32xf32> to vector<4x128xf32>
    %c0_1 = arith.constant 0 : index
    %c0_2 = arith.constant 0 : index
    %2 = vector.load %arg1[%c0_1, %c0_2] : memref<4x128xf32, #tpu.memory_space<vmem>>, vector<4x128xf32>
    tpu.vector_store %arg1[%c0_1, %c0_2], %1 {strides = array<i32>} : memref<4x128xf32, #tpu.memory_space<vmem>>, vector<4x128xf32>,
    return
  }
}

module attributes {stable_mosaic.version = 11 : i64} {
  func.func @_swiglu_mlp_kernel(%arg0: i32, %arg1: memref<16x32xf32, #tpu.memory_space<vmem>>, %arg2: memref<32x256xbf16, #tpu.memory_space<vmem>>, %arg3: memref<1x256xf32, #tpu.memory_space<vmem>>, %arg4: memref<128x32xbf16, #tpu.memory_space<vmem>>, %arg5: memref<1x32xf32, #tpu.memory_space<vmem>>, %arg6: memref<16x32xf32, #tpu.memory_space<vmem>>) attributes {dimension_semantics = [#tpu.dimension_semantics<parallel>], iteration_bounds = array<i64: 1>, scalar_prefetch = 0 : i64, scratch_operands = 0 : i64, tpu.core_type = #tpu.core_type<tc>, window_params = [{transform_indices = @transform_0, window_bounds = array<i64: 16, 32>}, {pipeline_mode = #tpu.pipeline_mode<synchronous>, transform_indices = @transform_1, window_bounds = array<i64: 32, 256>}, {pipeline_mode = #tpu.pipeline_mode<synchronous>, transform_indices = @transform_2, window_bounds = array<i64: 1, 256>}, {pipeline_mode = #tpu.pipeline_mode<synchronous>, transform_indices = @transform_3, window_bounds = array<i64: 128, 32>}, {pipeline_mode = #tpu.pipeline_mode<synchronous>, transform_indices = @transform_4, window_bounds = array<i64: 1, 32>}, {transform_indices = @transform_5, window_bounds = array<i64: 16, 32>}]} {
    %c0 = arith.constant 0 : index
    %c0_0 = arith.constant 0 : index
    %0 = vector.load %arg1[%c0, %c0_0] : memref<16x32xf32, #tpu.memory_space<vmem>>, vector<16x32xf32>
    %1 = arith.truncf %0 : vector<16x32xf32> to vector<16x32xbf16>
    %c0_1 = arith.constant 0 : index
    %c0_2 = arith.constant 0 : index
    %2 = vector.load %arg2[%c0_1, %c0_2] : memref<32x256xbf16, #tpu.memory_space<vmem>>, vector<32x256xbf16>
    %cst = arith.constant dense<0.000000e+00> : vector<16x256xf32>
    %3 = tpu.matmul %1, %2, %cst {dimension_numbers = #tpu.dot_dimension_numbers<[1], [0], [0], [1], [0, 0, 1, 1], [], []>} : vector<16x32xbf16>, vector<32x256xbf16>, vector<16x256xf32> -> vector<16x256xf32>
    %c0_3 = arith.constant 0 : index
    %c0_4 = arith.constant 0 : index
    %4 = vector.load %arg3[%c0_3, %c0_4] : memref<1x256xf32, #tpu.memory_space<vmem>>, vector<1x256xf32>
    %5 = vector.broadcast %4 : vector<1x256xf32> to vector<16x256xf32>
    %6 = arith.addf %3, %5 : vector<16x256xf32>
    %7 = vector.extract_strided_slice %6 {offsets = [0, 0], sizes = [16, 128], strides = [1, 1]} : vector<16x256xf32> to vector<16x128xf32>
    %8 = vector.extract_strided_slice %6 {offsets = [0, 128], sizes = [16, 128], strides = [1, 1]} : vector<16x256xf32> to vector<16x128xf32>
    %cst_5 = arith.constant 0.000000e+00 : f32
    %9 = vector.broadcast %cst_5 : f32 to vector<16x128xf32>
    %10 = arith.subf %9, %7 : vector<16x128xf32>
    %11 = math.exp %10 : vector<16x128xf32>
    %cst_6 = arith.constant 1.000000e+00 : f32
    %12 = vector.broadcast %cst_6 : f32 to vector<16x128xf32>
    %13 = arith.addf %12, %11 : vector<16x128xf32>
    %14 = tpu.reciprocal %13 {approx = true} : vector<16x128xf32> -> vector<16x128xf32>
    %15 = arith.mulf %7, %14 : vector<16x128xf32>
    %16 = arith.mulf %15, %8 : vector<16x128xf32>
    %17 = arith.truncf %16 : vector<16x128xf32> to vector<16x128xbf16>
    %c0_7 = arith.constant 0 : index
    %c0_8 = arith.constant 0 : index
    %18 = vector.load %arg4[%c0_7, %c0_8] : memref<128x32xbf16, #tpu.memory_space<vmem>>, vector<128x32xbf16>
    %cst_9 = arith.constant dense<0.000000e+00> : vector<16x32xf32>
    %19 = tpu.matmul %17, %18, %cst_9 {dimension_numbers = #tpu.dot_dimension_numbers<[1], [0], [0], [1], [0, 0, 1, 1], [], []>} : vector<16x128xbf16>, vector<128x32xbf16>, vector<16x32xf32> -> vector<16x32xf32>
    %c0_10 = arith.constant 0 : index
    %c0_11 = arith.constant 0 : index
    %20 = vector.load %arg5[%c0_10, %c0_11] : memref<1x32xf32, #tpu.memory_space<vmem>>, vector<1x32xf32>
    %21 = vector.broadcast %20 : vector<1x32xf32> to vector<16x32xf32>
    %22 = arith.addf %19, %21 : vector<16x32xf32>
    %c0_12 = arith.constant 0 : index
    %c0_13 = arith.constant 0 : index
    %23 = vector.load %arg6[%c0_12, %c0_13] : memref<16x32xf32, #tpu.memory_space<vmem>>, vector<16x32xf32>
    tpu.vector_store %arg6[%c0_12, %c0_13], %22 {strides = array<i32>} : memref<16x32xf32, #tpu.memory_space<vmem>>, vector<16x32xf32>,
    return
  }
  func.func @transform_0(%arg0: i32) -> (i32, i32) {
    %c0_i32 = arith.constant 0 : i32
    %c0_i32_0 = arith.constant 0 : i32
    return %arg0, %c0_i32 : i32, i32
  }
  func.func @transform_1(%arg0: i32) -> (i32, i32) {
    %c0_i32 = arith.constant 0 : i32
    %c0_i32_0 = arith.constant 0 : i32
    %c0_i32_1 = arith.constant 0 : i32
    return %c0_i32, %c0_i32_0 : i32, i32
  }
  func.func @transform_2(%arg0: i32) -> (i32, i32) {
    %c0_i32 = arith.constant 0 : i32
    %c0_i32_0 = arith.constant 0 : i32
    %c0_i32_1 = arith.constant 0 : i32
    return %c0_i32, %c0_i32_0 : i32, i32
  }
  func.func @transform_3(%arg0: i32) -> (i32, i32) {
    %c0_i32 = arith.constant 0 : i32
    %c0_i32_0 = arith.constant 0 : i32
    %c0_i32_1 = arith.constant 0 : i32
    return %c0_i32, %c0_i32_0 : i32, i32
  }
  func.func @transform_4(%arg0: i32) -> (i32, i32) {
    %c0_i32 = arith.constant 0 : i32
    %c0_i32_0 = arith.constant 0 : i32
    %c0_i32_1 = arith.constant 0 : i32
    return %c0_i32, %c0_i32_0 : i32, i32
  }
  func.func @transform_5(%arg0: i32) -> (i32, i32) {
    %c0_i32 = arith.constant 0 : i32
    %c0_i32_0 = arith.constant 0 : i32
    return %arg0, %c0_i32 : i32, i32
  }
}

</mosaic_0001>

<bundles_post_ra>
// kernel: tpu_custom_call.1
= control target key start
LH: loop header
LB: loop body
LE: loop exit
PB: predicated region body
PF: predicated region fallthrough
CT: control target
= control target key end

     0   :  { %6 = vsyncpa [#allocation3], 0  ;;  %s124_s0 = inlined_call_operand.hbm [shape: f32[8,128], index: 0, kind: input, shape index: {}]   ;;  %s125_s1 = inlined_call_operand.hbm [shape: f32[8,128], index: 1, kind: output, shape index: {}]  }
   0x1   :  { %7 = vsyncpa [#allocation4], 0  ;;  %s88_s6 = smov [#allocation2]   ;;  %s40_s10 = scalar_lea.hbm %s124_s0, 128 }
   0x2   :  { %s14_s7 = sshll.u32 %s88_s6, 4  ;;  %p41_p0 = scmp.ne.s32.totalorder %s124_s0, %s40_s10  ;;  %s15_s7 = int_to_ptr.vmem [resolvable:$true] %s14_s7 }
   0x3   :  { %p44_p1 = scmp.lt.u32.totalorder %s40_s10, %s124_s0 }
   0x5   :  { %p46_p2 = pnand %p44_p1, %p41_p0 }
   0x7   :  { %49 = shalt.err (!%p46_p2)
}
   0x8   :  { %s50_s15 = scalar_lea.vmem %s15_s7, 128  ;;  %p55_p4 = scmp.lt.s32.totalorder %s15_s7, %s15_s7 }
   0x9   :  { %p51_p3 = scmp.ne.s32.totalorder %s15_s7, %s50_s15  ;;  %p56_p5 = scmp.lt.s32.totalorder %s50_s15, %s50_s15 }
   0xb   :  { %p57_p6 = por %p56_p5, %p55_p4 }
   0xd   :  { %p58_p7 = pnand %p57_p6, %p51_p3 }
   0xf   :  { %61 = shalt.err (!%p58_p7)
}
  0x10   :  { %17 = dma.hbm_to_vmem [thread:$0]  %s124_s0, 128, %s15_s7, [#allocation3]  }
  0x11   :  { %84 = dma.done.wait [#allocation3], 128  }
  0x12   :  { %85 = vsyncadd [#allocation3], 4294967168  ;;  %s89_s18 = smov [#allocation5]   ;;  %v21_v0 = vld [vmem:[#allocation2] sm:$0xff] }
  0x13   :  { %s29_s19 = sshll.u32 %s89_s18, 4  ;;  %22 = vst [vmem:[#allocation5] sm:$0xff] %v21_v0  ;;  %s30_s19 = int_to_ptr.vmem [resolvable:$true] %s29_s19 }
  0x14   :  { %s62_s20 = scalar_lea.vmem %s30_s19, 128  ;;  %p67_p9 = scmp.lt.s32.totalorder %s30_s19, %s30_s19 }
  0x15   :  { %p63_p8 = scmp.ne.s32.totalorder %s30_s19, %s62_s20  ;;  %p68_p10 = scmp.lt.s32.totalorder %s62_s20, %s62_s20 }
  0x17   :  { %p69_p11 = por %p68_p10, %p67_p9 }
  0x19   :  { %p70_p12 = pnand %p69_p11, %p63_p8 }
  0x1b   :  { %73 = shalt.err (!%p70_p12)
}
  0x1c   :  { %s74_s23 = scalar_lea.hbm %s125_s1, 128 }
  0x1d   :  { %p75_p13 = scmp.ne.s32.totalorder %s125_s1, %s74_s23  ;;  %p78_p0 = scmp.lt.u32.totalorder %s74_s23, %s125_s1 }
  0x1f   :  { %p80_p1 = pnand %p78_p0, %p75_p13 }
  0x21   :  { %83 = shalt.err (!%p80_p1)
}
  0x22   :  { %32 = dma.vmem_to_hbm [thread:$0]  %s30_s19, 128, %s125_s1, [#allocation4]  }
  0x23   :  { %86 = dma.done.wait [#allocation4], 128  }
  0x24   :  { %87 = vsyncadd [#allocation4], 4294967168 }
  0x25   :  { %36 = vsyncpa [#allocation3], 1 }
  0x26   :  { %37 = vsyncpa [#allocation4], 1 }

// kernel: tpu_custom_call.1
= control target key start
LH: loop header
LB: loop body
LE: loop exit
PB: predicated region body
PF: predicated region fallthrough
CT: control target
= control target key end

     0   :  { %v348_v2 = vmov 0   ;;  %vm61_vm0 = vcmask 261120   ;;  %s447_s0 = inlined_call_operand.vmem [shape: f32[16,32], index: 0, kind: input, shape index: {}]   ;;  %s448_s1 = inlined_call_operand.vmem [shape: bf16[32,256], index: 1, kind: input, shape index: {}]   ;;  %s449_s2 = inlined_call_operand.vmem [shape: f32[1,256], index: 2, kind: input, shape index: {}]   ;;  %s450_s3 = inlined_call_operand.vmem [shape: bf16[128,32], index: 3, kind: input, shape index: {}]   ;;  %s451_s4 = inlined_call_operand.vmem [shape: f32[1,32], index: 4, kind: input, shape index: {}]   ;;  %s452_s5 = inlined_call_operand.hbm [shape: f32[16,32], index: 5, kind: output, shape index: {}]  }
   0x1   :  { %v302_v0 = vld [vmem:[%s448_s1 + $0x4] ss:$8 sps:$4 sm:$0xff]   ;;  %v304_v1 = vld [vmem:[%s448_s1] ss:$8 sps:$4 sm:$0xff]   ;;  %97 = vmatprep.mubr.bf16.mxu0 %v348_v2  ;;  %v305_v3 = vld [vmem:[%s448_s1 + $0x14] ss:$8 sps:$4 sm:$0xff]  }
   0x2   :  { %65 = vmatprep.subr.bf16.mxu0 %v302_v0  ;;  %v307_v4 = vld [vmem:[%s448_s1 + $0x10] ss:$8 sps:$4 sm:$0xff]   ;;  %v22_v5 = vld [vmem:[%s447_s0] sm:$0xff]  ;;  %v23_v6 = vld [vmem:[%s447_s0 + $0x8] sm:$0xff] }
   0x3   :  { %66 = vmatpush1.bf16.msra.mxu0 %v304_v1  ;;  %v24_v7 = vpack.c.bf16 %v23_v6, %v22_v5 }
   0x4   :  { %67 = vmatprep.subr.bf16.mxu0 %v305_v3 }
   0x7   :  { %68 = vmatpush1.bf16.msra.mxu0 %v307_v4 }
   0x8   :  { %10 = vsyncpa [#allocation3], 0  ;;  %v308_v8 = vld [vmem:[%s450_s3] sm:$0xff]   ;;  %v349_v9 = vmov 0.0   ;;  %v309_v10 = vld [vmem:[%s450_s3 + $0x8] sm:$0xff]   ;;  %vm350_vm1 = vmmov 0   ;;  %v31_v17 = vlaneseq }
   0x9   :  { %276 = vmatprep.subr.bf16.mxu1 %v349_v9  ;;  %v310_v11 = vld [vmem:[%s450_s3 + $0x10] sm:$0xff]   ;;  %v311_v12 = vld [vmem:[%s450_s3 + $0x18] sm:$0xff]   ;;  %v312_v13 = vld [vmem:[%s450_s3 + $0x20] sm:$0xff]   ;;  %292 = vmatprep.mubr.msk.bf16.mxu1 %vm350_vm1, %v349_v9  ;;  %s351_s21 = smov [#allocation2]  }
   0xa   :  { %257 = vmatmul.mubr.msk.bf16.vlgmr.msra.gmra.mrb[0].mxu0 %vm61_vm0, %v24_v7  ;;  %277 = vmatpush3.bf16.msra.mxu1 %v308_v8  ;;  %v313_v14 = vld [vmem:[%s450_s3 + $0x28] sm:$0xff]   ;;  %v314_v15 = vld [vmem:[%s450_s3 + $0x30] sm:$0xff]   ;;  %v315_v16 = vld [vmem:[%s450_s3 + $0x38] sm:$0xff]   ;;  %v32_v18 = vshrl.u32 %v31_v17, 7  ;;  %s242_s22 = sshll.u32 %s351_s21, 4  ;;  %s243_s22 = int_to_ptr.vmem [resolvable:$true] %s242_s22 }
   0xb   :  { %278 = vmatprep.subr.bf16.mxu1 %v349_v9  ;;  %v29_v20 = vld [vmem:[%s449_s2] sm:$0x3]  ;;  %s324_s23 = scalar_lea.vmem %s243_s22, 256  ;;  %p329_p1 = scmp.lt.s32.totalorder %s243_s22, %s243_s22 }
   0xc   :  { %v33_v19 = vsub.s32 0, %v32_v18  ;;  %v37_v36 = vsub.s32 1, %v32_v18  ;;  %v258_v47 = vld [vmem:[%s451_s4] ss:$0 sm:$0xff]  ;;  %p325_p0 = scmp.ne.s32.totalorder %s243_s22, %s324_s23  ;;  %p330_p2 = scmp.lt.s32.totalorder %s324_s23, %s324_s23 }
   0xe   :  { %279 = vmatpush3.bf16.msra.mxu1 %v309_v10  ;;  %v34_v21 = vrot.slane %v29_v20, %v33_v19  ;;  %v38_v37 = vrot.slane %v29_v20, %v37_v36  ;;  %p331_p3 = por %p330_p2, %p329_p1 }
   0xf   :  { %280 = vmatprep.subr.bf16.mxu1 %v349_v9 }
  0x10   :  { %p332_p4 = pnand %p331_p3, %p325_p0 }
  0x12   :  { %281 = vmatpush3.bf16.msra.mxu1 %v310_v11 }
  0x13   :  { %282 = vmatprep.subr.bf16.mxu1 %v349_v9 }
  0x16   :  { %283 = vmatpush3.bf16.msra.mxu1 %v311_v12 }
  0x17   :  { %284 = vmatprep.subr.bf16.mxu1 %v349_v9 }
  0x1a   :  { %285 = vmatpush3.bf16.msra.mxu1 %v312_v13 }
  0x1b   :  { %286 = vmatprep.subr.bf16.mxu1 %v349_v9 }
  0x1e   :  { %287 = vmatpush3.bf16.msra.mxu1 %v313_v14 }
  0x1f   :  { %288 = vmatprep.subr.bf16.mxu1 %v349_v9 }
  0x22   :  { %289 = vmatpush3.bf16.msra.mxu1 %v314_v15 }
  0x23   :  { %290 = vmatprep.subr.bf16.mxu1 %v349_v9 }
  0x26   :  { %291 = vmatpush3.bf16.msra.mxu1 %v315_v16 }
  0xdd   :  { %v99_v22 = vpop.f32.mrb[0].mxu0 }
  0xde   :  { %v100_v23 = vadd.f32 %v99_v22, %v34_v21  ;;  %v101_v24 = vpop.f32.mrb[1].mxu0 }
  0xdf   :  { %v103_v25 = vpop.f32.mrb[2].mxu0  ;;  %v102_v40 = vadd.f32 %v101_v24, %v38_v37 }
  0xe0   :  { %v108_v26 = vsub.f32 0.0, %v100_v23  ;;  %v104_v27 = vadd.f32 %v103_v25, %v34_v21  ;;  %v105_v28 = vpop.f32.mrb[3].mxu0 }
  0xe1   :  { %v106_v44 = vadd.f32 %v105_v28, %v38_v37 }
  0xe2   :  { %v110_v29 = vmul.f32 1.442695, %v108_v26  ;;  %v109_v30 = vsub.f32 0.0, %v104_v27 }
  0xe4   :  { %316 = vpow2.f32 %v110_v29  ;;  %v112_v31 = vmul.f32 1.442695, %v109_v30 }
  0xe6   :  { %318 = vpow2.f32 %v112_v31 }
  0xee   :  { %v317_v32 = vpop.eup %316 }
  0xef   :  { %v114_v33 = vadd.f32 1.0, %v317_v32 }
  0xf0   :  { %v319_v34 = vpop.eup %318 }
  0xf1   :  { %320 = vrcp.f32 %v114_v33  ;;  %v115_v35 = vadd.f32 1.0, %v319_v34 }
  0xf3   :  { %322 = vrcp.f32 %v115_v35 }
  0xfb   :  { %v321_v38 = vpop.eup %320 }
  0xfc   :  { %v118_v39 = vmul.f32 %v321_v38, %v100_v23 }
  0xfd   :  { %v323_v41 = vpop.eup %322 }
  0xfe   :  { %v120_v42 = vmul.f32 %v118_v39, %v102_v40  ;;  %v119_v43 = vmul.f32 %v323_v41, %v104_v27 }
 0x100   :  { %v121_v45 = vmul.f32 %v119_v43, %v106_v44 }
 0x102   :  { %v122_v46 = vpack.c.bf16 %v121_v45, %v120_v42 }
 0x104   :  { %293 = vmatmul.mubr.bf16.vlgmr.msra.gmra.mrb[0].mxu1 %v122_v46 }
 0x1d7   :  { %v228_v48 = vpop.f32.mrb[0].mxu1 }
 0x1d8   :  { %v229_v49 = vadd.f32 %v258_v47, %v228_v48  ;;  %v294_v50 = vpop.f32.mrb[1].mxu1 }
 0x1d9   :  { %v231_v51 = vpop.f32.mrb[2].mxu1 }
 0x1da   :  { %235 = vst.msk [vmem:[#allocation2] sm:$0xff] %vm61_vm0, %v229_v49  ;;  %v232_v52 = vadd.f32 %v258_v47, %v231_v51  ;;  %v295_v53 = vpop.f32.mrb[3].mxu1 }
 0x1dc   :  { %236 = vst.msk [vmem:[#allocation2 + $0x8] sm:$0xff] %vm61_vm0, %v232_v52 }
 0x1dd   :  { %335 = shalt.err (!%p332_p4)
}
 0x1de   :  { %s336_s25 = scalar_lea.hbm %s452_s5, 256 }
 0x1df   :  { %p337_p5 = scmp.ne.s32.totalorder %s452_s5, %s336_s25  ;;  %p340_p6 = scmp.lt.u32.totalorder %s336_s25, %s452_s5 }
 0x1e1   :  { %p342_p7 = pnand %p340_p6, %p337_p5 }
 0x1e3   :  { %345 = shalt.err (!%p342_p7)
}
 0x1e4   :  { %s352_s30 = smov 128   ;;  %s353_s6 = smov 8  }
 0x1e5   :  { %248 = dma.vmem_to_hbm [thread:$0]  %s243_s22, 256, %s452_s5, [#allocation3], %s352_s30, %s352_s30, %s353_s6  }
 0x1e6   :  { %346 = dma.done.wait [#allocation3], 256  }
 0x1e7   :  { %347 = vsyncadd [#allocation3], 4294967040 }
 0x1e8   :  { %252 = vsyncpa [#allocation3], 1 }

</bundles_post_ra>
